<compile_context>
chip_gen: v7x
topology: tpu7x:2x2x1
jax: 0.10.0
libtpu: 0.0.40
codegen_flags: <defaults>
</compile_context>

<pallas_src>
import functools

import jax
import jax.numpy as jnp
from jax.experimental import pallas as pl
from jax.experimental.pallas import tpu as pltpu

LANES = 128
SUBLANES = 8


def _cdiv(a: int, b: int) -> int:
    return -(-a // b)


def _round_up(x: int, m: int) -> int:
    return (x + m - 1) // m * m


def _sublane_multiple(*dtypes) -> int:
    """Packed-sublane multiple: 8 for 4-byte, 16 for 2-byte, 32 for 1-byte."""
    m = SUBLANES
    for dt in dtypes:
        item = jnp.dtype(dt).itemsize
        m = max(m, SUBLANES * max(1, 4 // max(1, item)))
    return m


def _default_block_rows() -> int:
    """Generation-aware tile height (rows of 128 lanes)."""
    try:
        kind = jax.devices()[0].device_kind.lower()
    except Exception:
        return 2048
    if "v7" in kind:
        return 8192          # 4 MiB f32 tiles; v7x HBM is fast, VMEM 64 MiB
    if any(v in kind for v in ("v2", "v3", "v4", "v5")):
        return 2048          # keep within v5e's 16 MiB default scoped VMEM
    return 4096              # v6e / unknown


def _maybe_buffered_spec(block_shape, index_map, depth):
    """BlockSpec with pipeline_mode=pl.Buffered(depth) when available."""
    if depth is not None and hasattr(pl, "Buffered"):
        try:
            return pl.BlockSpec(block_shape, index_map,
                                pipeline_mode=pl.Buffered(depth))
        except TypeError:
            pass
    return pl.BlockSpec(block_shape, index_map)


def _modulating_factor(one_minus_pt, gamma: float):
    """(1 - p_t) ** gamma. Small integer gamma -> VPU multiply chain (keeps the
    pow's log+exp off the single EUP slot); otherwise clamped jnp.power."""
    g = float(gamma)
    if g == 0.0:
        return jnp.ones_like(one_minus_pt)
    if g.is_integer() and 1.0 <= g <= 8.0:
        gi = int(g)
        result = None
        base = one_minus_pt
        while gi > 0:          # exponentiation by squaring, all static
            if gi & 1:
                result = base if result is None else result * base
            gi >>= 1
            if gi:
                base = base * base
        return result
    # non-integer gamma: clamp so rounding can't make the base negative -> NaN
    return jnp.power(jnp.maximum(one_minus_pt, 0.0), g)


def _focal_loss_math(x, t, alpha: float, gamma: float):
    """Shared elementwise focal-loss math (f32 in, f32 out). Works both inside
    the Pallas kernel and as plain JAX (used for the <128-element tail)."""
    # One exp shared between sigmoid and the numerically-stable BCE log term:
    #   e  = exp(-|x|)
    #   p  = sigmoid(x) = 1/(1+e) if x>=0 else e/(1+e)
    #   ce = max(x,0) - x*t + log1p(e)
    e = jnp.exp(-jnp.abs(x))
    inv = 1.0 / (1.0 + e)
    p = jnp.where(x >= 0, inv, e * inv)
    ce = jnp.maximum(x, 0.0) - x * t + jnp.log1p(e)

    # 1 - p_t = 1 - (p*t + (1-p)*(1-t)) = p + t - 2*p*t
    one_minus_pt = p + t - 2.0 * p * t
    loss = ce * _modulating_factor(one_minus_pt, gamma)

    if alpha >= 0:
        # alpha_t = alpha*t + (1-alpha)*(1-t) = (1-alpha) + (2*alpha-1)*t
        loss = ((1.0 - alpha) + (2.0 * alpha - 1.0) * t) * loss
    return loss


def _focal_loss_elementwise_kernel(x_ref, t_ref, o_ref, *, alpha, gamma):
    x = x_ref[...].astype(jnp.float32)
    t = t_ref[...].astype(jnp.float32)
    o_ref[...] = _focal_loss_math(x, t, alpha, gamma).astype(o_ref.dtype)


def _focal_loss_sum_kernel(x_ref, t_ref, o_ref, acc_ref, *, alpha, gamma,
                           rows_valid, block_rows, blocks_per_core,
                           needs_mask):
    """Accumulates per-lane partial sums into a (block_rows, 128) f32 VMEM
    scratch; one cross-lane/sublane reduce + store in the epilogue."""
    i = pl.program_id(1)

    @pl.when(i == 0)
    def _init():
        acc_ref[...] = jnp.zeros_like(acc_ref)

    x = x_ref[...].astype(jnp.float32)
    t = t_ref[...].astype(jnp.float32)
    loss = _focal_loss_math(x, t, alpha, gamma)

    if needs_mask:
        # Only the ragged last block and (for an odd block count) the clamped
        # duplicate block need masking; steady-state blocks take the cheap path.
        blk = pl.program_id(0) * blocks_per_core + i
        valid = rows_valid - blk * block_rows    # # of real rows in this block

        @pl.when(valid >= block_rows)
        def _full():
            acc_ref[...] += loss

        @pl.when(valid < block_rows)
        def _ragged():
            rid = jax.lax.broadcasted_iota(jnp.int32, loss.shape, 0)
            # select (NOT multiply) so garbage in the padded / duplicate block
            # cannot leak NaN/Inf into the sum
            acc_ref[...] += jnp.where(rid < valid, loss, 0.0)
    else:
        acc_ref[...] += loss

    @pl.when(i == blocks_per_core - 1)
    def _finalize():
        o_ref[...] = jnp.sum(acc_ref[...], keepdims=True)


def focal_loss(inputs, targets, *, alpha: float = 0.25, gamma: float = 2.0,
               reduction: str = "none", block_rows: int | None = None):
    """Focal loss forward matching the PyTorch module: returns the mean for
    reduction='mean', otherwise the unreduced elementwise loss (the original
    module applies no reduction for 'none'/'sum')."""
    assert inputs.shape == targets.shape
    orig_shape = inputs.shape
    orig_dtype = inputs.dtype
    n = int(inputs.size)
    alpha = float(alpha)
    gamma = float(gamma)

    x_flat = inputs.reshape(-1)
    t_flat = targets.reshape(-1)

    rows_full = n // LANES
    tail = n - rows_full * LANES

    def _tail_loss(xs, ts):
        return _focal_loss_math(xs.astype(jnp.float32),
                                ts.astype(jnp.float32), alpha, gamma)

    # Too small for even one (rows, 128) slab: plain XLA (negligible work).
    if rows_full == 0:
        loss = _tail_loss(x_flat, t_flat)
        if reduction == "mean":
            return jnp.mean(loss).astype(orig_dtype)
        return loss.astype(orig_dtype).reshape(orig_shape)

    n_bulk = rows_full * LANES
    if tail:
        # No full-array jnp.pad: the kernel sees only the lane-exact bulk; the
        # <128-element ragged tail is handled with plain XLA below.
        x_bulk, x_tail = x_flat[:n_bulk], x_flat[n_bulk:]
        t_bulk, t_tail = t_flat[:n_bulk], t_flat[n_bulk:]
    else:
        x_bulk, t_bulk = x_flat, t_flat
        x_tail = t_tail = None

    x2d = x_bulk.reshape(rows_full, LANES)
    t2d = t_bulk.reshape(rows_full, LANES)

    if block_rows is None:
        block_rows = _default_block_rows()
    mult = _sublane_multiple(x2d.dtype, t2d.dtype, orig_dtype)
    br = _round_up(max(1, min(int(block_rows), rows_full)), mult)
    if br >= rows_full:
        br = rows_full            # full-dim block is always layout-legal
    nb = _cdiv(rows_full, br)

    in_tile = br * LANES * (x2d.dtype.itemsize + t2d.dtype.itemsize)
    in_bytes = (x2d.dtype.itemsize + t2d.dtype.itemsize) * n_bulk

    if reduction == "mean":
        # Megacore split: leading "parallel" axis of 2 core-groups, each with a
        # private scratch accumulator and its own partial-sum output block.
        groups = 2 if nb >= 2 else 1
        bpc = _cdiv(nb, groups)
        needs_mask = (rows_full % br != 0) or (groups * bpc != nb)

        def in_map(c, i):
            # Clamp so the duplicate block (odd nb) never DMAs out of bounds;
            # the in-kernel row mask keeps it out of the sum.
            return (jnp.minimum(c * bpc + i, nb - 1), 0)

        in_spec = _maybe_buffered_spec((br, LANES), in_map, 3)

        kernel = functools.partial(
            _focal_loss_sum_kernel, alpha=alpha, gamma=gamma,
            rows_valid=rows_full, block_rows=br, blocks_per_core=bpc,
            needs_mask=needs_mask)

        acc_bytes = br * LANES * 4
        vmem_limit = int(min(3 * in_tile + acc_bytes + (16 << 20), 56 << 20))

        partials = pl.pallas_call(
            kernel,
            out_shape=jax.ShapeDtypeStruct((groups, 1, 1), jnp.float32),
            grid_spec=pltpu.PrefetchScalarGridSpec(
                num_scalar_prefetch=0,
                grid=(groups, bpc),
                in_specs=[in_spec, in_spec],
                out_specs=pl.BlockSpec((None, 1, 1), lambda c, i: (c, 0, 0)),
                scratch_shapes=[pltpu.VMEM((br, LANES), jnp.float32)],
            ),
            compiler_params=pltpu.CompilerParams(
                dimension_semantics=("parallel", "arbitrary"),
                vmem_limit_bytes=vmem_limit),
            cost_estimate=pl.CostEstimate(
                flops=22 * n_bulk, transcendentals=2 * n_bulk,
                bytes_accessed=in_bytes + 4 * groups),
        )(x2d, t2d)

        total = jnp.sum(partials)
        if tail:
            total = total + jnp.sum(_tail_loss(x_tail, t_tail))
        return (total / jnp.float32(n)).astype(orig_dtype)

    # elementwise ('none' / 'sum': module forward applies no reduction here)
    kernel = functools.partial(_focal_loss_elementwise_kernel,
                               alpha=alpha, gamma=gamma)
    io_spec = pl.BlockSpec((br, LANES), lambda i: (i, 0))
    out_tile = br * LANES * jnp.dtype(orig_dtype).itemsize
    vmem_limit = int(min(2 * (in_tile + out_tile) + (16 << 20), 56 << 20))

    out2d = pl.pallas_call(
        kernel,
        out_shape=jax.ShapeDtypeStruct((rows_full, LANES), orig_dtype),
        grid_spec=pltpu.PrefetchScalarGridSpec(
            num_scalar_prefetch=0,
            grid=(nb,),
            in_specs=[io_spec, io_spec],
            out_specs=io_spec,
        ),
        compiler_params=pltpu.CompilerParams(
            dimension_semantics=("parallel",),
            vmem_limit_bytes=vmem_limit),
        cost_estimate=pl.CostEstimate(
            flops=20 * n_bulk, transcendentals=2 * n_bulk,
            bytes_accessed=in_bytes + jnp.dtype(orig_dtype).itemsize * n_bulk),
    )(x2d, t2d)

    loss = out2d.reshape(-1)
    if tail:
        loss = jnp.concatenate(
            [loss, _tail_loss(x_tail, t_tail).astype(orig_dtype)])
    return loss.reshape(orig_shape)


def _focal_loss_ref(inputs, targets, alpha=0.25, gamma=2.0, reduction="none"):
    """Pure-JAX reference mirroring the PyTorch module."""
    x = inputs.astype(jnp.float32)
    t = targets.astype(jnp.float32)
    p = jax.nn.sigmoid(x)
    ce = jnp.maximum(x, 0.0) - x * t + jnp.log1p(jnp.exp(-jnp.abs(x)))
    p_t = p * t + (1 - p) * (1 - t)
    loss = ce * (1 - p_t) ** gamma
    if alpha >= 0:
        alpha_t = alpha * t + (1 - alpha) * (1 - t)
        loss = alpha_t * loss
    if reduction == "mean":
        return jnp.mean(loss)
    return loss


if __name__ == "__main__":
    key = jax.random.PRNGKey(0)
    k1, k2, k3, k4, k5, k6, k7, k8 = jax.random.split(key, 8)

    # 1) NCHW-like shape: batch=2, channels=4, spatial=16x16 (lane-divisible)
    shape = (2, 4, 16, 16)
    logits = jax.random.normal(k1, shape, dtype=jnp.float32)
    targets = (jax.random.uniform(k2, shape) > 0.5).astype(jnp.float32)

    out = jax.block_until_ready(
        focal_loss(logits, targets, alpha=0.25, gamma=2.0, reduction="none"))
    ref = _focal_loss_ref(logits, targets, 0.25, 2.0, "none")
    assert out.shape == shape
    assert jnp.allclose(out, ref, atol=1e-5, rtol=1e-5), "mismatch ('none')"

    out_mean = jax.block_until_ready(
        focal_loss(logits, targets, alpha=0.25, gamma=2.0, reduction="mean"))
    ref_mean = _focal_loss_ref(logits, targets, 0.25, 2.0, "mean")
    assert jnp.allclose(out_mean, ref_mean, atol=1e-5, rtol=1e-5), \
        "mismatch ('mean')"

    # 2) Ragged shape (not lane/sublane divisible): minimal-copy tail path
    shape2 = (3, 5, 7, 11)
    logits2 = jax.random.normal(k3, shape2, dtype=jnp.float32)
    targets2 = (jax.random.uniform(k4, shape2) > 0.5).astype(jnp.float32)

    out2 = jax.block_until_ready(focal_loss(logits2, targets2,
                                            reduction="none"))
    ref2 = _focal_loss_ref(logits2, targets2)
    assert jnp.allclose(out2, ref2, atol=1e-5, rtol=1e-5), "mismatch ragged"

    out2_mean = jax.block_until_ready(focal_loss(logits2, targets2,
                                                 reduction="mean"))
    ref2_mean = _focal_loss_ref(logits2, targets2, reduction="mean")
    assert jnp.allclose(out2_mean, ref2_mean, atol=1e-5, rtol=1e-5), \
        "mismatch ragged mean"

    # 3) Multi-block, evenly tiled: exercises the unmasked fast path and the
    #    two-group (megacore) mean reduction.
    shape3 = (8192 * 128,)
    logits3 = jax.random.normal(k5, shape3, dtype=jnp.float32)
    targets3 = (jax.random.uniform(k6, shape3) > 0.5).astype(jnp.float32)
    out3 = jax.block_until_ready(focal_loss(logits3, targets3,
                                            reduction="none"))
    ref3 = _focal_loss_ref(logits3, targets3)
    assert jnp.allclose(out3, ref3, atol=1e-5, rtol=1e-5), "mismatch big none"
    out3_mean = jax.block_until_ready(focal_loss(logits3, targets3,
                                                 reduction="mean"))
    ref3_mean = _focal_loss_ref(logits3, targets3, reduction="mean")
    assert jnp.allclose(out3_mean, ref3_mean, atol=1e-5, rtol=1e-5), \
        "mismatch big mean"

    # 4) Multi-block, ragged rows AND ragged tail: exercises pl.when-gated
    #    row masking, the clamped duplicate block, and the XLA tail.
    shape4 = (1_050_000,)
    logits4 = jax.random.normal(k7, shape4, dtype=jnp.float32)
    targets4 = (jax.random.uniform(k8, shape4) > 0.5).astype(jnp.float32)
    out4 = jax.block_until_ready(focal_loss(logits4, targets4,
                                            reduction="none"))
    ref4 = _focal_loss_ref(logits4, targets4)
    assert jnp.allclose(out4, ref4, atol=1e-5, rtol=1e-5), \
        "mismatch big ragged none"
    out4_mean = jax.block_until_ready(focal_loss(logits4, targets4,
                                                 reduction="mean"))
    ref4_mean = _focal_loss_ref(logits4, targets4, reduction="mean")
    assert jnp.allclose(out4_mean, ref4_mean, atol=1e-5, rtol=1e-5), \
        "mismatch big ragged mean"

    print("KERNEL_OK")
</pallas_src>

<mosaic_0001>
module attributes {stable_mosaic.version = 11 : i64} {
  func.func @_focal_loss_elementwise_kernel(%arg0: i32, %arg1: memref<16x128xf32, #tpu.memory_space<vmem>>, %arg2: memref<16x128xf32, #tpu.memory_space<vmem>>, %arg3: memref<16x128xf32, #tpu.memory_space<vmem>>) attributes {dimension_semantics = [#tpu.dimension_semantics<parallel>], iteration_bounds = array<i64: 1>, scalar_prefetch = 0 : i64, scratch_operands = 0 : i64, tpu.core_type = #tpu.core_type<tc>, window_params = [{transform_indices = @transform_0, window_bounds = array<i64: 16, 128>}, {transform_indices = @transform_1, window_bounds = array<i64: 16, 128>}, {transform_indices = @transform_2, window_bounds = array<i64: 16, 128>}]} {
    %c0 = arith.constant 0 : index
    %c0_0 = arith.constant 0 : index
    %0 = vector.load %arg1[%c0, %c0_0] : memref<16x128xf32, #tpu.memory_space<vmem>>, vector<16x128xf32>
    %c0_1 = arith.constant 0 : index
    %c0_2 = arith.constant 0 : index
    %1 = vector.load %arg2[%c0_1, %c0_2] : memref<16x128xf32, #tpu.memory_space<vmem>>, vector<16x128xf32>
    %2 = math.absf %0 : vector<16x128xf32>
    %cst = arith.constant 0.000000e+00 : f32
    %3 = vector.broadcast %cst : f32 to vector<16x128xf32>
    %4 = arith.subf %3, %2 : vector<16x128xf32>
    %5 = math.exp %4 : vector<16x128xf32>
    %cst_3 = arith.constant 1.000000e+00 : f32
    %6 = vector.broadcast %cst_3 : f32 to vector<16x128xf32>
    %7 = arith.addf %6, %5 : vector<16x128xf32>
    %cst_4 = arith.constant 1.000000e+00 : f32
    %8 = vector.broadcast %cst_4 : f32 to vector<16x128xf32>
    %9 = arith.divf %8, %7 : vector<16x128xf32>
    %cst_5 = arith.constant 0.000000e+00 : f32
    %10 = vector.broadcast %cst_5 : f32 to vector<16x128xf32>
    %11 = arith.cmpf oge, %0, %10 : vector<16x128xf32>
    %12 = arith.mulf %5, %9 : vector<16x128xf32>
    %13 = arith.select %11, %9, %12 : vector<16x128xi1>, vector<16x128xf32>
    %cst_6 = arith.constant 0.000000e+00 : f32
    %14 = vector.broadcast %cst_6 : f32 to vector<16x128xf32>
    %15 = arith.maximumf %0, %14 : vector<16x128xf32>
    %16 = arith.mulf %0, %1 : vector<16x128xf32>
    %17 = arith.subf %15, %16 : vector<16x128xf32>
    %18 = math.log1p %5 : vector<16x128xf32>
    %19 = arith.addf %17, %18 : vector<16x128xf32>
    %20 = arith.addf %13, %1 : vector<16x128xf32>
    %cst_7 = arith.constant 2.000000e+00 : f32
    %21 = vector.broadcast %cst_7 : f32 to vector<16x128xf32>
    %22 = arith.mulf %21, %13 : vector<16x128xf32>
    %23 = arith.mulf %22, %1 : vector<16x128xf32>
    %24 = arith.subf %20, %23 : vector<16x128xf32>
    %25 = arith.mulf %24, %24 : vector<16x128xf32>
    %26 = arith.mulf %19, %25 : vector<16x128xf32>
    %cst_8 = arith.constant -5.000000e-01 : f32
    %27 = vector.broadcast %cst_8 : f32 to vector<16x128xf32>
    %28 = arith.mulf %27, %1 : vector<16x128xf32>
    %cst_9 = arith.constant 7.500000e-01 : f32
    %29 = vector.broadcast %cst_9 : f32 to vector<16x128xf32>
    %30 = arith.addf %29, %28 : vector<16x128xf32>
    %31 = arith.mulf %30, %26 : vector<16x128xf32>
    %c0_10 = arith.constant 0 : index
    %c0_11 = arith.constant 0 : index
    %32 = vector.load %arg3[%c0_10, %c0_11] : memref<16x128xf32, #tpu.memory_space<vmem>>, vector<16x128xf32>
    tpu.vector_store %arg3[%c0_10, %c0_11], %31 {strides = array<i32>} : memref<16x128xf32, #tpu.memory_space<vmem>>, vector<16x128xf32>,
    return
  }
  func.func @transform_0(%arg0: i32) -> (i32, i32) {
    %c0_i32 = arith.constant 0 : i32
    %c0_i32_0 = arith.constant 0 : i32
    return %arg0, %c0_i32 : i32, i32
  }
  func.func @transform_1(%arg0: i32) -> (i32, i32) {
    %c0_i32 = arith.constant 0 : i32
    %c0_i32_0 = arith.constant 0 : i32
    return %arg0, %c0_i32 : i32, i32
  }
  func.func @transform_2(%arg0: i32) -> (i32, i32) {
    %c0_i32 = arith.constant 0 : i32
    %c0_i32_0 = arith.constant 0 : i32
    return %arg0, %c0_i32 : i32, i32
  }
}

</mosaic_0001>

<bundles_post_ra>
// kernel: tpu_custom_call.1
= control target key start
LH: loop header
LB: loop body
LE: loop exit
PB: predicated region body
PF: predicated region fallthrough
CT: control target
= control target key end

     0   :  { %7 = vsyncpa [#allocation3], 0  ;;  %s289_s0 = inlined_call_operand.hbm [shape: f32[16,128], index: 0, kind: input, shape index: {}]   ;;  %s290_s1 = inlined_call_operand.hbm [shape: f32[16,128], index: 1, kind: input, shape index: {}]   ;;  %s291_s2 = inlined_call_operand.hbm [shape: f32[16,128], index: 2, kind: output, shape index: {}]  }
   0x1   :  { %8 = vsyncpa [#allocation6], 0 }
   0x2   :  { %9 = vsyncpa [#allocation4], 0  ;;  %s217_s9 = smov [#allocation2]   ;;  %s145_s13 = scalar_lea.hbm %s289_s0, 256 }
   0x3   :  { %s15_s10 = sshll.u32 %s217_s9, 4  ;;  %p146_p0 = scmp.ne.s32.totalorder %s289_s0, %s145_s13  ;;  %s16_s10 = int_to_ptr.vmem [resolvable:$true] %s15_s10 }
   0x4   :  { %p149_p1 = scmp.lt.u32.totalorder %s145_s13, %s289_s0 }
   0x6   :  { %p151_p2 = pnand %p149_p1, %p146_p0 }
   0x8   :  { %154 = shalt.err (!%p151_p2)
}
   0x9   :  { %s155_s18 = scalar_lea.vmem %s16_s10, 256  ;;  %p160_p4 = scmp.lt.s32.totalorder %s16_s10, %s16_s10 }
   0xa   :  { %p156_p3 = scmp.ne.s32.totalorder %s16_s10, %s155_s18  ;;  %p161_p5 = scmp.lt.s32.totalorder %s155_s18, %s155_s18 }
   0xc   :  { %p162_p6 = por %p161_p5, %p160_p4 }
   0xe   :  { %p163_p7 = pnand %p162_p6, %p156_p3 }
  0x10   :  { %166 = shalt.err (!%p163_p7)
}
  0x11   :  { %s218_s19 = smov 128   ;;  %s219_s20 = smov 8  }
  0x12   :  { %21 = dma.hbm_to_vmem [thread:$0]  %s289_s0, 256, %s16_s10, [#allocation3], %s218_s19, %s218_s19, %s219_s20  }
  0x13   :  { %s220_s23 = smov [#allocation5]   ;;  %s167_s27 = scalar_lea.hbm %s290_s1, 256 }
  0x14   :  { %s27_s24 = sshll.u32 %s220_s23, 4  ;;  %p168_p8 = scmp.ne.s32.totalorder %s290_s1, %s167_s27  ;;  %s28_s24 = int_to_ptr.vmem [resolvable:$true] %s27_s24 }
  0x15   :  { %p171_p9 = scmp.lt.u32.totalorder %s167_s27, %s290_s1 }
  0x17   :  { %p173_p10 = pnand %p171_p9, %p168_p8 }
  0x19   :  { %176 = shalt.err (!%p173_p10)
}
  0x1a   :  { %s177_s4 = scalar_lea.vmem %s28_s24, 256  ;;  %p182_p12 = scmp.lt.s32.totalorder %s28_s24, %s28_s24 }
  0x1b   :  { %p178_p11 = scmp.ne.s32.totalorder %s28_s24, %s177_s4  ;;  %p183_p13 = scmp.lt.s32.totalorder %s177_s4, %s177_s4 }
  0x1d   :  { %p184_p0 = por %p183_p13, %p182_p12 }
  0x1f   :  { %p185_p1 = pnand %p184_p0, %p178_p11 }
  0x21   :  { %188 = shalt.err (!%p185_p1)
}
  0x22   :  { %33 = dma.hbm_to_vmem [thread:$0]  %s290_s1, 256, %s28_s24, [#allocation6], %s218_s19, %s218_s19, %s219_s20  }
  0x23   :  { %211 = dma.done.wait [#allocation3], 256  }
  0x24   :  { %212 = vsyncadd [#allocation3], 4294967040 }
  0x25   :  { %213 = dma.done.wait [#allocation6], 256  }
  0x26   :  { %214 = vsyncadd [#allocation6], 4294967040  ;;  %v40_v0 = vld [vmem:[#allocation2] sm:$0xff]  ;;  %v41_v1 = vld [vmem:[#allocation2 + $0x8] sm:$0xff]  ;;  %s221_s1 = smov [#allocation7]  }
  0x27   :  { %v44_v2 = vand.u32 2147483647, %v40_v0  ;;  %v45_v3 = vand.u32 2147483647, %v41_v1  ;;  %v42_v14 = vld [vmem:[#allocation5] sm:$0xff]  ;;  %v64_v17 = vmax.f32 %v40_v0, 0.0 }
  0x28   :  { %v66_v18 = vmul.f32 %v42_v14, %v40_v0  ;;  %v43_v19 = vld [vmem:[#allocation5 + $0x8] sm:$0xff]  ;;  %vm58_vm0 = vcmp.ge.f32.partialorder %v40_v0, 0.0  ;;  %vm59_vm1 = vcmp.ge.f32.partialorder %v41_v1, 0.0  ;;  %v65_v29 = vmax.f32 %v41_v1, 0.0  ;;  %s115_s6 = sshll.u32 %s221_s1, 4  ;;  %s116_s6 = int_to_ptr.vmem [resolvable:$true] %s115_s6 }
  0x29   :  { %v46_v4 = vsub.f32 0.0, %v44_v2  ;;  %v47_v5 = vsub.f32 0.0, %v45_v3  ;;  %v67_v30 = vmul.f32 %v43_v19, %v41_v1  ;;  %v102_v40 = vmul.f32 -0.5, %v42_v14  ;;  %s189_s7 = scalar_lea.vmem %s116_s6, 256  ;;  %p194_p3 = scmp.lt.s32.totalorder %s116_s6, %s116_s6 }
  0x2a   :  { %v68_v33 = vsub.f32 %v64_v17, %v66_v18  ;;  %v103_v50 = vmul.f32 -0.5, %v43_v19  ;;  %p190_p2 = scmp.ne.s32.totalorder %s116_s6, %s189_s7  ;;  %p195_p4 = scmp.lt.s32.totalorder %s189_s7, %s189_s7 }
  0x2b   :  { %v48_v6 = vmul.f32 1.442695, %v46_v4  ;;  %v50_v7 = vmul.f32 1.442695, %v47_v5  ;;  %v69_v43 = vsub.f32 %v65_v29, %v67_v30  ;;  %v104_v52 = vadd.f32 0.75, %v102_v40 }
  0x2c   :  { %v105_v57 = vadd.f32 0.75, %v103_v50  ;;  %p196_p5 = por %p195_p4, %p194_p3 }
  0x2d   :  { %133 = vpow2.f32 %v48_v6 }
  0x2e   :  { %135 = vpow2.f32 %v50_v7  ;;  %p197_p6 = pnand %p196_p5, %p190_p2 }
  0x37   :  { %v134_v8 = vpop.eup %133 }
  0x38   :  { %v136_v9 = vpop.eup %135  ;;  %v52_v10 = vadd.f32 1.0, %v134_v8  ;;  %v73_v12 = vmul.f32 -0.5, %v134_v8  ;;  %v76_v16 = vand.u32 2147483647, %v134_v8 }
  0x39   :  { %v53_v11 = vadd.f32 1.0, %v136_v9  ;;  %v82_v13 = vmul.f32 -0.5, %v136_v9  ;;  %v85_v22 = vand.u32 2147483647, %v136_v9 }
  0x3a   :  { %137 = vrcp.f32 %v52_v10  ;;  %v74_v15 = vadd.f32 1.0, %v73_v12  ;;  %vm267_vm2 = vcmp.lt.f32.partialorder %v76_v16, 0.0004427343 }
  0x3b   :  { %139 = vlog2.f32 %v52_v10  ;;  %v83_v20 = vadd.f32 1.0, %v82_v13  ;;  %vm86_vm3 = vcmp.lt.f32.partialorder %v85_v22, 0.0004427343 }
  0x3c   :  { %141 = vrcp.f32 %v53_v11  ;;  %v75_v25 = vmul.f32 %v134_v8, %v74_v15 }
  0x3d   :  { %143 = vlog2.f32 %v53_v11  ;;  %v84_v35 = vmul.f32 %v136_v9, %v83_v20 }
  0x44   :  { %v138_v21 = vpop.eup %137 }
  0x45   :  { %v140_v23 = vpop.eup %139  ;;  %v60_v24 = vmul.f32 %v138_v21, %v134_v8 }
  0x46   :  { %v142_v26 = vpop.eup %141  ;;  %v72_v27 = vmul.f32 0.6931472, %v140_v23 }
  0x47   :  { %v144_v31 = vpop.eup %143  ;;  %v62_v32 = vsel %vm58_vm0, %v138_v21, %v60_v24  ;;  %v61_v34 = vmul.f32 %v142_v26, %v136_v9 }
  0x48   :  { %v90_v36 = vadd.f32 %v62_v32, %v42_v14  ;;  %v92_v37 = vmul.f32 2.0, %v62_v32  ;;  %v81_v38 = vmul.f32 0.6931472, %v144_v31  ;;  %v78_v39 = vsel %vm267_vm2, %v75_v25, %v72_v27 }
  0x49   :  { %v63_v41 = vsel %vm59_vm1, %v142_v26, %v61_v34  ;;  %v88_v47 = vadd.f32 %v78_v39, %v68_v33 }
  0x4a   :  { %v94_v42 = vmul.f32 %v92_v37, %v42_v14  ;;  %v91_v44 = vadd.f32 %v63_v41, %v43_v19  ;;  %v93_v45 = vmul.f32 2.0, %v63_v41  ;;  %v87_v46 = vsel %vm86_vm3, %v84_v35, %v81_v38 }
  0x4b   :  { %v89_v53 = vadd.f32 %v87_v46, %v69_v43 }
  0x4c   :  { %v96_v48 = vsub.f32 %v90_v36, %v94_v42  ;;  %v95_v49 = vmul.f32 %v93_v45, %v43_v19 }
  0x4e   :  { %v98_v51 = vmul.f32 %v96_v48, %v96_v48  ;;  %v97_v54 = vsub.f32 %v91_v44, %v95_v49 }
  0x50   :  { %v100_v55 = vmul.f32 %v98_v51, %v88_v47  ;;  %v99_v56 = vmul.f32 %v97_v54, %v97_v54 }
  0x52   :  { %v106_v58 = vmul.f32 %v104_v52, %v100_v55  ;;  %v101_v59 = vmul.f32 %v99_v56, %v89_v53 }
  0x54   :  { %108 = vst [vmem:[#allocation7] sm:$0xff] %v106_v58  ;;  %v107_v60 = vmul.f32 %v105_v57, %v101_v59 }
  0x56   :  { %109 = vst [vmem:[#allocation7 + $0x8] sm:$0xff] %v107_v60 }
  0x57   :  { %200 = shalt.err (!%p197_p6)
}
  0x58   :  { %s201_s10 = scalar_lea.hbm %s291_s2, 256 }
  0x59   :  { %p202_p7 = scmp.ne.s32.totalorder %s291_s2, %s201_s10  ;;  %p205_p8 = scmp.lt.u32.totalorder %s201_s10, %s291_s2 }
  0x5b   :  { %p207_p9 = pnand %p205_p8, %p202_p7 }
  0x5d   :  { %210 = shalt.err (!%p207_p9)
}
  0x5e   :  { %121 = dma.vmem_to_hbm [thread:$0]  %s116_s6, 256, %s291_s2, [#allocation4], %s218_s19, %s218_s19, %s219_s20  }
  0x5f   :  { %215 = dma.done.wait [#allocation4], 256  }
  0x60   :  { %216 = vsyncadd [#allocation4], 4294967040 }
  0x61   :  { %125 = vsyncpa [#allocation3], 1 }
  0x62   :  { %126 = vsyncpa [#allocation6], 1 }
  0x63   :  { %127 = vsyncpa [#allocation4], 1 }

</bundles_post_ra>
